<compile_context>
chip_gen: v6e
topology: v6e:2x2x1
jax: 0.10.0
libtpu: 0.0.40
codegen_flags: <defaults>
</compile_context>

<pallas_src>
import jax
import jax.numpy as jnp
from jax.experimental import pallas as pl
from jax.experimental.pallas import tpu as pltpu

_LANES = 128


def _drop_path_kernel(scale_ref, x_ref, o_ref):
    """One (TR, 128) tile per grid step.

    scale_ref : (TR, 1) f32 per-row scale (0 or 1/keep_prob), lane-broadcast
    x_ref     : (TR, 128) input tile
    o_ref     : (TR, 128) output tile
    """
    o_ref[...] = (x_ref[...].astype(jnp.float32) * scale_ref[...]).astype(o_ref.dtype)


def _target_tile_bytes():
    # v7x HBM (~3.2 TB/s) makes the fixed per-grid-step cost relatively more
    # expensive -> use bigger tiles there.  2 MiB elsewhere (already ~85% of the
    # mem-bound roofline and safe for v5e's 16 MiB default scoped VMEM with
    # in+out double-buffering).
    try:
        kind = jax.devices()[0].device_kind.lower()
    except Exception:
        return 2 << 20
    if "v7" in kind or "tpu7" in kind:
        return 4 << 20
    return 2 << 20


def _choose_tile_rows(total_rows, itemsize, target_bytes):
    """Row-tile size for a (total_rows, 128) slab: dtype-aware sublane
    alignment, capped by the byte budget.  No divisibility requirement --
    the grid uses cdiv and Pallas masks the partial tail block."""
    align = 8 * max(1, 4 // max(1, itemsize))          # 8 f32, 16 bf16, 32 i8/fp8
    max_rows = max(align, (target_bytes // (itemsize * _LANES)) // align * align)
    if total_rows <= max_rows:
        return total_rows                               # single full-extent block
    return max_rows                                     # aligned tile + masked tail


def drop_path_pallas(x, drop_prob, training, seed=0, donate_x=False):
    """JAX/Pallas equivalent of DropPath.forward.  x: (B, ...)."""
    if (not training) or (drop_prob is None) or (float(drop_prob) == 0.0):
        return x
    if not jnp.issubdtype(x.dtype, jnp.floating):
        raise TypeError(f"drop_path_pallas requires a floating dtype, got {x.dtype}")

    keep_prob = 1.0 - float(drop_prob)
    orig_shape = x.shape
    B = int(orig_shape[0])
    M = 1
    for d in orig_shape[1:]:
        M *= int(d)

    # Per-sample Bernoulli(keep_prob) scale (0 or 1/keep_prob), in plain JAX.
    # TODO(synk): callers must thread a fresh seed/key every step; jax.random
    # cannot bit-match torch's RNG stream.
    key = jax.random.PRNGKey(seed)
    keep = jax.random.bernoulli(key, p=keep_prob, shape=(B,))
    scale = keep.astype(jnp.float32) * jnp.float32(1.0 / keep_prob)

    # Lane-dense, batch-collapsed layout: pad each sample up to a multiple of
    # 128 elements (multiplying zero padding is harmless) and view the whole
    # batch as a (B*rows_per_sample, 128) slab.
    m_pad = (-M) % _LANES
    rows_per_sample = (M + m_pad) // _LANES
    total_rows = B * rows_per_sample

    x2 = x.reshape(B, M)
    if m_pad:
        x2 = jnp.pad(x2, ((0, 0), (0, m_pad)))
    x2 = x2.reshape(total_rows, _LANES)

    # Row-expanded scale column (tiny vs. the x traffic).
    scale_rows = jnp.repeat(scale, rows_per_sample).reshape(total_rows, 1)

    itemsize = jnp.dtype(x.dtype).itemsize
    tile_rows = _choose_tile_rows(total_rows, itemsize, _target_tile_bytes())
    grid = (pl.cdiv(total_rows, tile_rows),)

    kwargs = {}
    if donate_x:
        # Alias the x slab (input 1) to the output to avoid a second B*M HBM
        # buffer when the caller donates x.
        kwargs["input_output_aliases"] = {1: 0}

    out = pl.pallas_call(
        _drop_path_kernel,
        out_shape=jax.ShapeDtypeStruct((total_rows, _LANES), x.dtype),
        grid_spec=pltpu.PrefetchScalarGridSpec(
            num_scalar_prefetch=0,
            grid=grid,
            in_specs=[
                pl.BlockSpec((tile_rows, 1), lambda r: (r, 0)),        # scale
                pl.BlockSpec((tile_rows, _LANES), lambda r: (r, 0)),   # x
            ],
            out_specs=pl.BlockSpec((tile_rows, _LANES), lambda r: (r, 0)),
        ),
        compiler_params=pltpu.CompilerParams(
            # One large uniform axis -> splits evenly across TCs on v7x.
            dimension_semantics=("parallel",),
        ),
        **kwargs,
    )(scale_rows, x2)

    out = out.reshape(B, rows_per_sample * _LANES)
    if m_pad:
        out = out[:, :M]
    return out.reshape(orig_shape)


def _check_semantics(x, y, keep_prob, rtol=1e-5, atol=1e-5):
    xf = jnp.asarray(x, jnp.float32)
    yf = jnp.asarray(y, jnp.float32)
    for b in range(x.shape[0]):
        is_zero = bool(jnp.all(yf[b] == 0.0))
        is_scaled = bool(jnp.allclose(yf[b], xf[b] / keep_prob, rtol=rtol, atol=atol))
        assert is_zero or is_scaled, "DropPath mask semantics violated"


if __name__ == "__main__":
    key = jax.random.PRNGKey(0)
    drop_prob = 0.25
    keep_prob = 1.0 - drop_prob

    # Main case: lane-divisible per-sample size (M = 4*16*16 = 1024).
    x = jax.random.normal(key, (2, 4, 16, 16), dtype=jnp.float32)
    y = jax.block_until_ready(drop_path_pallas(x, drop_prob, training=True, seed=0))
    assert y.shape == x.shape and y.dtype == x.dtype
    _check_semantics(x, y, keep_prob)

    # Non-128-divisible per-sample size (M = 3*5*7 = 105) -> padded lane path.
    x_odd = jax.random.normal(jax.random.PRNGKey(1), (2, 3, 5, 7), dtype=jnp.float32)
    y_odd = jax.block_until_ready(drop_path_pallas(x_odd, drop_prob, training=True, seed=3))
    assert y_odd.shape == x_odd.shape
    _check_semantics(x_odd, y_odd, keep_prob)

    # bf16 path (sublane packing factor 16).
    x_bf = jax.random.normal(jax.random.PRNGKey(2), (2, 8, 32), dtype=jnp.bfloat16)
    y_bf = jax.block_until_ready(drop_path_pallas(x_bf, drop_prob, training=True, seed=7))
    assert y_bf.shape == x_bf.shape and y_bf.dtype == jnp.bfloat16
    _check_semantics(x_bf, y_bf, keep_prob, rtol=2e-2, atol=2e-2)

    # Eval path is the identity (matches the PyTorch module in .eval()).
    y_eval = jax.block_until_ready(drop_path_pallas(x, drop_prob, training=False))
    assert bool(jnp.allclose(y_eval, x)), "eval path must be identity"

    print("KERNEL_OK")
</pallas_src>

<mosaic_0001>
module attributes {stable_mosaic.version = 11 : i64} {
  func.func @_drop_path_kernel(%arg0: i32, %arg1: memref<16x1xf32, #tpu.memory_space<vmem>>, %arg2: memref<16x128xf32, #tpu.memory_space<vmem>>, %arg3: memref<16x128xf32, #tpu.memory_space<vmem>>) attributes {dimension_semantics = [#tpu.dimension_semantics<parallel>], iteration_bounds = array<i64: 1>, scalar_prefetch = 0 : i64, scratch_operands = 0 : i64, tpu.core_type = #tpu.core_type<tc>, window_params = [{transform_indices = @transform_0, window_bounds = array<i64: 16, 1>}, {transform_indices = @transform_1, window_bounds = array<i64: 16, 128>}, {transform_indices = @transform_2, window_bounds = array<i64: 16, 128>}]} {
    %c0 = arith.constant 0 : index
    %c0_0 = arith.constant 0 : index
    %0 = vector.load %arg2[%c0, %c0_0] : memref<16x128xf32, #tpu.memory_space<vmem>>, vector<16x128xf32>
    %c0_1 = arith.constant 0 : index
    %c0_2 = arith.constant 0 : index
    %1 = vector.load %arg1[%c0_1, %c0_2] : memref<16x1xf32, #tpu.memory_space<vmem>>, vector<16x1xf32>
    %2 = vector.broadcast %1 : vector<16x1xf32> to vector<16x128xf32>
    %3 = arith.mulf %0, %2 : vector<16x128xf32>
    %c0_3 = arith.constant 0 : index
    %c0_4 = arith.constant 0 : index
    %4 = vector.load %arg3[%c0_3, %c0_4] : memref<16x128xf32, #tpu.memory_space<vmem>>, vector<16x128xf32>
    tpu.vector_store %arg3[%c0_3, %c0_4], %3 {strides = array<i32>} : memref<16x128xf32, #tpu.memory_space<vmem>>, vector<16x128xf32>,
    return
  }
  func.func @transform_0(%arg0: i32) -> (i32, i32) {
    %c0_i32 = arith.constant 0 : i32
    %c0_i32_0 = arith.constant 0 : i32
    return %arg0, %c0_i32 : i32, i32
  }
  func.func @transform_1(%arg0: i32) -> (i32, i32) {
    %c0_i32 = arith.constant 0 : i32
    %c0_i32_0 = arith.constant 0 : i32
    return %arg0, %c0_i32 : i32, i32
  }
  func.func @transform_2(%arg0: i32) -> (i32, i32) {
    %c0_i32 = arith.constant 0 : i32
    %c0_i32_0 = arith.constant 0 : i32
    return %arg0, %c0_i32 : i32, i32
  }
}

</mosaic_0001>

<bundles_post_ra>
// kernel: tpu_custom_call.1
= control target key start
LH: loop header
LB: loop body
LE: loop exit
PB: predicated region body
PF: predicated region fallthrough
CT: control target
= control target key end

     0   :  { %v73_v1 = vmov 0   ;;  %s107_s0 = inlined_call_operand.vmem [shape: f32[16,1], index: 0, kind: input, shape index: {}]   ;;  %s108_s1 = inlined_call_operand.vmem [shape: f32[16,128], index: 1, kind: input, shape index: {}]   ;;  %s109_s2 = inlined_call_operand.hbm [shape: f32[16,128], index: 2, kind: output, shape index: {}]  }
   0x1   :  { %v14_v0 = vld [vmem:[%s107_s0] sm:$0xff]  ;;  %50 = vset.pattern.permute.xlu0 %v73_v1 }
   0x2   :  { %7 = vsyncpa [#allocation3], 0  ;;  %18 = vperm.xlu0 %50, %v14_v0   ;;  %v15_v2 = vld [vmem:[%s107_s0 + $0x8] sm:$0xff]  ;;  %v12_v3 = vld [vmem:[%s108_s1] sm:$0xff]  ;;  %s74_s15 = smov [#allocation2]  }
   0x3   :  { %s35_s16 = sshll.u32 %s74_s15, 4  ;;  %v13_v6 = vld [vmem:[%s108_s1 + $0x8] sm:$0xff]  ;;  %s36_s16 = int_to_ptr.vmem [resolvable:$true] %s35_s16 }
   0x4   :  { %s51_s19 = scalar_lea.vmem %s36_s16, 256  ;;  %p56_p1 = scmp.lt.s32.totalorder %s36_s16, %s36_s16 }
   0x5   :  { %p52_p0 = scmp.ne.s32.totalorder %s36_s16, %s51_s19  ;;  %p57_p2 = scmp.lt.s32.totalorder %s51_s19, %s51_s19 }
   0x6   :  { %23 = vperm.xlu0 %50, %v15_v2  }
   0x7   :  { %p58_p3 = por %p57_p2, %p56_p1 }
   0x9   :  { %p59_p4 = pnand %p58_p3, %p52_p0 }
  0x7d   :  { %v19_v4 = vpop.permute.xlu0 %18 }
  0x7e   :  { %v26_v5 = vmul.f32 %v19_v4, %v12_v3 }
  0x80   :  { %28 = vst [vmem:[#allocation2] sm:$0xff] %v26_v5 }
  0x81   :  { %v24_v7 = vpop.permute.xlu0 %23 }
  0x82   :  { %v27_v8 = vmul.f32 %v24_v7, %v13_v6 }
  0x84   :  { %29 = vst [vmem:[#allocation2 + $0x8] sm:$0xff] %v27_v8 }
  0x85   :  { %62 = shalt.err (!%p59_p4)
}
  0x86   :  { %s75_s0 = smov 128   ;;  %s76_s20 = smov 8  }
  0x87   :  { %41 = dma.vmem_to_hbm [thread:$0]  %s36_s16, 256, %s109_s2, [#allocation3], %s75_s0, %s75_s0, %s76_s20  }
  0x88   :  { %71 = dma.done.wait [#allocation3], 256  }
  0x89   :  { %72 = vsyncadd [#allocation3], 4294967040 }
  0x8a   :  { %45 = vsyncpa [#allocation3], 1 }

</bundles_post_ra>
